<compile_context>
chip_gen: v7x
topology: tpu7x:2x2x1
jax: 0.10.0
libtpu: 0.0.40
codegen_flags: <defaults>
</compile_context>

<pallas_src>
import functools
import math

import jax
import jax.numpy as jnp
from jax import lax
from jax.experimental import pallas as pl
from jax.experimental.pallas import tpu as pltpu


# ---------------------------------------------------------------------------
# helpers
# ---------------------------------------------------------------------------
def _pick_tile(dim, target, granule):
    """Largest tile <= target that divides dim and is a multiple of granule.
    If dim <= target, use the full dim (block == full array dim is legal)."""
    if dim <= target:
        return dim
    t = (target // granule) * granule
    while t >= granule:
        if dim % t == 0:
            return t
        t -= granule
    return dim


# ---------------------------------------------------------------------------
# Kernel 1: fused QKV projection.  y = x @ Wt + b  (Wt pre-transposed, bf16)
# with three full-width outputs (q, k, v) so no strided slicing happens in
# JAX afterwards.
# ---------------------------------------------------------------------------
def _qkv_linear_kernel(x_ref, wt_ref, b_ref, q_ref, k_ref, v_ref, acc_ref,
                       *, embed_dim):
    @pl.when(pl.program_id(1) == 0)
    def _():
        acc_ref[...] = jnp.zeros_like(acc_ref)

    acc_ref[...] += jnp.dot(
        x_ref[...], wt_ref[...], preferred_element_type=jnp.float32
    )

    @pl.when(pl.program_id(1) == pl.num_programs(1) - 1)
    def _():
        y = acc_ref[...] + b_ref[...]
        E = embed_dim
        q_ref[...] = y[:, :E].astype(q_ref.dtype)
        k_ref[...] = y[:, E:2 * E].astype(k_ref.dtype)
        v_ref[...] = y[:, 2 * E:].astype(v_ref.dtype)


def pallas_qkv_linear(x2d, wt, b, embed_dim, tm=256, tk=512):
    M, K = x2d.shape
    K2, N = wt.shape
    assert K == K2 and N == 3 * embed_dim
    tm = _pick_tile(M, tm, 8)
    tk = _pick_tile(K, tk, 128)
    grid = (M // tm, K // tk)
    kernel = functools.partial(_qkv_linear_kernel, embed_dim=embed_dim)
    out_shapes = tuple(
        jax.ShapeDtypeStruct((M, embed_dim), jnp.bfloat16) for _ in range(3))
    return pl.pallas_call(
        kernel,
        out_shape=out_shapes,
        grid=grid,
        in_specs=[
            pl.BlockSpec((tm, tk), lambda i, k: (i, k)),
            pl.BlockSpec((tk, N), lambda i, k: (k, 0)),
            pl.BlockSpec((1, N), lambda i, k: (0, 0)),
        ],
        out_specs=tuple(
            pl.BlockSpec((tm, embed_dim), lambda i, k: (i, 0))
            for _ in range(3)),
        scratch_shapes=[pltpu.VMEM((tm, N), jnp.float32)],
        compiler_params=pltpu.CompilerParams(
            dimension_semantics=("parallel", "arbitrary")),
    )(x2d, wt, b.reshape(1, N))


# ---------------------------------------------------------------------------
# Kernel 2: tiled linear  y = x @ Wt + b   (optional fused ReLU), bf16 in,
# f32 accumulate, bf16 out.
# ---------------------------------------------------------------------------
def _linear_kernel(x_ref, wt_ref, b_ref, o_ref, acc_ref, *, activation):
    @pl.when(pl.program_id(2) == 0)
    def _():
        acc_ref[...] = jnp.zeros_like(acc_ref)

    acc_ref[...] += jnp.dot(
        x_ref[...], wt_ref[...], preferred_element_type=jnp.float32
    )

    @pl.when(pl.program_id(2) == pl.num_programs(2) - 1)
    def _():
        y = acc_ref[...] + b_ref[...]
        if activation == "relu":
            y = jnp.maximum(y, 0.0)
        o_ref[...] = y.astype(o_ref.dtype)


def pallas_linear(x2d, wt, b, activation=None, tm=256, tn=256, tk=512):
    M, K = x2d.shape
    K2, N = wt.shape
    assert K == K2
    tm = _pick_tile(M, tm, 8)
    tn = _pick_tile(N, tn, 128)
    tk = _pick_tile(K, tk, 128)
    grid = (M // tm, N // tn, K // tk)
    kernel = functools.partial(_linear_kernel, activation=activation)
    return pl.pallas_call(
        kernel,
        out_shape=jax.ShapeDtypeStruct((M, N), jnp.bfloat16),
        grid=grid,
        in_specs=[
            pl.BlockSpec((tm, tk), lambda i, j, k: (i, k)),
            pl.BlockSpec((tk, tn), lambda i, j, k: (k, j)),
            pl.BlockSpec((1, tn), lambda i, j, k: (0, j)),
        ],
        out_specs=pl.BlockSpec((tm, tn), lambda i, j, k: (i, j)),
        scratch_shapes=[pltpu.VMEM((tm, tn), jnp.float32)],
        compiler_params=pltpu.CompilerParams(
            dimension_semantics=("parallel", "parallel", "arbitrary")),
    )(x2d, wt, b.reshape(1, N))


# ---------------------------------------------------------------------------
# Kernel 3: linear + residual-add + LayerNorm fused into the last-k epilogue.
#   out = LayerNorm(residual + x @ Wt + b) * gamma + beta
# tn is forced to the full output width E so the whole row is in the block.
# ---------------------------------------------------------------------------
def _linear_add_ln_kernel(x_ref, wt_ref, b_ref, res_ref, g_ref, beta_ref,
                          o_ref, acc_ref, *, eps):
    @pl.when(pl.program_id(1) == 0)
    def _():
        acc_ref[...] = jnp.zeros_like(acc_ref)

    acc_ref[...] += jnp.dot(
        x_ref[...], wt_ref[...], preferred_element_type=jnp.float32
    )

    @pl.when(pl.program_id(1) == pl.num_programs(1) - 1)
    def _():
        y = acc_ref[...] + b_ref[...] + res_ref[...].astype(jnp.float32)
        mean = jnp.mean(y, axis=-1, keepdims=True)
        c = y - mean
        var = jnp.mean(c * c, axis=-1, keepdims=True)
        inv = lax.rsqrt(var + eps)
        o_ref[...] = (c * inv * g_ref[...] + beta_ref[...]).astype(o_ref.dtype)


def pallas_linear_add_ln(x2d, wt, b, res2d, gamma, beta, eps=1e-5,
                         tm=256, tk=512):
    M, K = x2d.shape
    K2, E = wt.shape
    assert K == K2 and res2d.shape == (M, E)
    tm = _pick_tile(M, tm, 8)
    tk = _pick_tile(K, tk, 128)
    grid = (M // tm, K // tk)
    kernel = functools.partial(_linear_add_ln_kernel, eps=eps)
    return pl.pallas_call(
        kernel,
        out_shape=jax.ShapeDtypeStruct((M, E), jnp.bfloat16),
        grid=grid,
        in_specs=[
            pl.BlockSpec((tm, tk), lambda i, k: (i, k)),
            pl.BlockSpec((tk, E), lambda i, k: (k, 0)),
            pl.BlockSpec((1, E), lambda i, k: (0, 0)),
            pl.BlockSpec((tm, E), lambda i, k: (i, 0)),
            pl.BlockSpec((1, E), lambda i, k: (0, 0)),
            pl.BlockSpec((1, E), lambda i, k: (0, 0)),
        ],
        out_specs=pl.BlockSpec((tm, E), lambda i, k: (i, 0)),
        scratch_shapes=[pltpu.VMEM((tm, E), jnp.float32)],
        compiler_params=pltpu.CompilerParams(
            dimension_semantics=("parallel", "arbitrary")),
    )(x2d, wt, b.reshape(1, E), res2d, gamma.reshape(1, E), beta.reshape(1, E))


# ---------------------------------------------------------------------------
# Kernel 4: flash-style multi-head attention.
#   grid = (batch, q_tiles, kv_tiles) with the kv axis "arbitrary".
#   Online softmax per head with m/l/acc in VMEM scratch.  The 1/sqrt(D)
#   scale is folded into W_q, so q arrives pre-scaled.  Output is merged
#   (B, S, E) bf16, one full-width lane-dense store per q tile.
# ---------------------------------------------------------------------------
def _flash_mha_kernel(q_ref, k_ref, v_ref, o_ref, m_sc, l_sc, acc_sc,
                      *, num_heads, head_dim):
    kv_step = pl.program_id(2)

    @pl.when(kv_step == 0)
    def _():
        m_sc[...] = jnp.full_like(m_sc, -jnp.inf)
        l_sc[...] = jnp.zeros_like(l_sc)
        acc_sc[...] = jnp.zeros_like(acc_sc)

    q = q_ref[0]            # (tq,  E) bf16, already scaled by 1/sqrt(D)
    k = k_ref[0]            # (tkv, E) bf16
    v = v_ref[0]            # (tkv, E) bf16

    for h in range(num_heads):
        lo = h * head_dim
        hi = lo + head_dim
        # QK^T without an explicit transpose: contract dim 1 with dim 1.
        s = lax.dot_general(
            q[:, lo:hi], k[:, lo:hi],
            dimension_numbers=(((1,), (1,)), ((), ())),
            preferred_element_type=jnp.float32,
        )                                            # (tq, tkv) f32
        m_prev = m_sc[:, h:h + 1]                    # (tq, 1)
        m_new = jnp.maximum(m_prev, jnp.max(s, axis=-1, keepdims=True))
        alpha = jnp.exp(m_prev - m_new)
        p = jnp.exp(s - m_new)
        l_sc[:, h:h + 1] = alpha * l_sc[:, h:h + 1] + jnp.sum(
            p, axis=-1, keepdims=True)
        acc_sc[:, lo:hi] = alpha * acc_sc[:, lo:hi] + jnp.dot(
            p.astype(v.dtype), v[:, lo:hi], preferred_element_type=jnp.float32)
        m_sc[:, h:h + 1] = m_new

    @pl.when(kv_step == pl.num_programs(2) - 1)
    def _():
        for h in range(num_heads):
            lo = h * head_dim
            hi = lo + head_dim
            acc_sc[:, lo:hi] = acc_sc[:, lo:hi] * pl.reciprocal(
                l_sc[:, h:h + 1], approx=True)
        o_ref[0] = acc_sc[...].astype(o_ref.dtype)


def pallas_mha(q, k, v, num_heads, tq_target=128, tkv_target=256):
    B, S, E = q.shape
    D = E // num_heads
    tq = _pick_tile(S, tq_target, 8)
    tkv = _pick_tile(S, tkv_target, 8)
    grid = (B, S // tq, S // tkv)
    kernel = functools.partial(_flash_mha_kernel, num_heads=num_heads,
                               head_dim=D)
    return pl.pallas_call(
        kernel,
        out_shape=jax.ShapeDtypeStruct((B, S, E), jnp.bfloat16),
        grid=grid,
        in_specs=[
            pl.BlockSpec((1, tq, E), lambda b, i, j: (b, i, 0)),
            pl.BlockSpec((1, tkv, E), lambda b, i, j: (b, j, 0)),
            pl.BlockSpec((1, tkv, E), lambda b, i, j: (b, j, 0)),
        ],
        out_specs=pl.BlockSpec((1, tq, E), lambda b, i, j: (b, i, 0)),
        scratch_shapes=[
            pltpu.VMEM((tq, num_heads), jnp.float32),   # running max m
            pltpu.VMEM((tq, num_heads), jnp.float32),   # running sum l
            pltpu.VMEM((tq, E), jnp.float32),           # merged-head acc
        ],
        compiler_params=pltpu.CompilerParams(
            dimension_semantics=("parallel", "parallel", "arbitrary")),
    )(q, k, v)


# ---------------------------------------------------------------------------
# Positional encoding table (sin/cos, same as the PyTorch module buffer)
# ---------------------------------------------------------------------------
def make_positional_encoding(max_len, embed_dim):
    pos = jnp.arange(max_len, dtype=jnp.float32)[:, None]
    div = jnp.exp(
        jnp.arange(0, embed_dim, 2, dtype=jnp.float32)
        * (-math.log(10000.0) / embed_dim)
    )
    pe = jnp.zeros((max_len, embed_dim), dtype=jnp.float32)
    pe = pe.at[:, 0::2].set(jnp.sin(pos * div))
    pe = pe.at[:, 1::2].set(jnp.cos(pos * div))
    return pe


# ---------------------------------------------------------------------------
# Parameter init (PyTorch layout, f32) + wrapper-side preparation done ONCE:
# pre-transpose weights, fold 1/sqrt(D) into W_q/b_q, fuse QKV, cast to bf16.
# ---------------------------------------------------------------------------
def init_raw_params(key, vocab_size, embed_dim, num_heads, num_layers,
                    dim_ff, max_len):
    keys = jax.random.split(key, 1 + num_layers)

    def norm(k, shape, scale=0.05):
        return jax.random.normal(k, shape, dtype=jnp.float32) * scale

    raw = {
        "num_heads": num_heads,
        "embedding": norm(keys[0], (vocab_size, embed_dim), 0.1),
        "pe": make_positional_encoding(max_len, embed_dim),
        "layers": [],
    }
    E, F = embed_dim, dim_ff
    for li in range(num_layers):
        lk = jax.random.split(keys[1 + li], 16)
        raw["layers"].append({
            "wq": norm(lk[0], (E, E)), "bq": norm(lk[1], (E,)),
            "wk": norm(lk[2], (E, E)), "bk": norm(lk[3], (E,)),
            "wv": norm(lk[4], (E, E)), "bv": norm(lk[5], (E,)),
            "wo": norm(lk[6], (E, E)), "bo": norm(lk[7], (E,)),
            "ln1_g": 1.0 + norm(lk[8], (E,), 0.1), "ln1_b": norm(lk[9], (E,)),
            "wff1": norm(lk[10], (F, E)), "bff1": norm(lk[11], (F,)),
            "wff2": norm(lk[12], (E, F)), "bff2": norm(lk[13], (E,)),
            "ln2_g": 1.0 + norm(lk[14], (E,), 0.1), "ln2_b": norm(lk[15], (E,)),
        })
    return raw


def prepare_kernel_params(raw):
    H = raw["num_heads"]
    prep = {
        "num_heads": H,
        "embedding": raw["embedding"],
        "pe": raw["pe"],
        "layers": [],
    }
    for L in raw["layers"]:
        E = L["wq"].shape[0]
        D = E // H
        scale = 1.0 / math.sqrt(float(D))
        wq_scaled = L["wq"] * scale          # fold 1/sqrt(D) into W_q, b_q
        bq_scaled = L["bq"] * scale
        w_qkv = jnp.concatenate([wq_scaled, L["wk"], L["wv"]], axis=0)  # (3E,E)
        prep["layers"].append({
            "w_qkv_t": w_qkv.T.astype(jnp.bfloat16),                    # (E,3E)
            "b_qkv": jnp.concatenate([bq_scaled, L["bk"], L["bv"]]),    # (3E,)
            "w_o_t": L["wo"].T.astype(jnp.bfloat16), "b_o": L["bo"],
            "ln1_g": L["ln1_g"], "ln1_b": L["ln1_b"],
            "w_ff1_t": L["wff1"].T.astype(jnp.bfloat16), "b_ff1": L["bff1"],
            "w_ff2_t": L["wff2"].T.astype(jnp.bfloat16), "b_ff2": L["bff2"],
            "ln2_g": L["ln2_g"], "ln2_b": L["ln2_b"],
        })
    return prep


# ---------------------------------------------------------------------------
# Full encoder forward (Pallas kernels for all dense math)
# ---------------------------------------------------------------------------
def transformer_encoder_forward(prep, tokens):
    B, S = tokens.shape
    x = jnp.take(prep["embedding"], tokens, axis=0)       # gather in plain JAX
    x = x + prep["pe"][:S][None, :, :]
    x = x.astype(jnp.bfloat16)                             # bf16 residual stream
    E = x.shape[-1]
    H = prep["num_heads"]

    for L in prep["layers"]:
        x2 = x.reshape(B * S, E)

        # fused Q/K/V projection: one (E -> 3E) matmul, three bf16 outputs.
        q2, k2, v2 = pallas_qkv_linear(x2, L["w_qkv_t"], L["b_qkv"], E)
        q = q2.reshape(B, S, E)
        k = k2.reshape(B, S, E)
        v = v2.reshape(B, S, E)

        # flash-style MHA, merged-head (B, S, E) bf16 output; attention
        # weights are never materialized (discarded by the encoder block).
        attn = pallas_mha(q, k, v, H)

        # out-projection fused with residual add + LayerNorm.
        y1 = pallas_linear_add_ln(attn.reshape(B * S, E), L["w_o_t"], L["b_o"],
                                  x2, L["ln1_g"], L["ln1_b"])

        # FFN: linear+ReLU, then linear fused with residual add + LayerNorm.
        h = pallas_linear(y1, L["w_ff1_t"], L["b_ff1"], activation="relu")
        y2 = pallas_linear_add_ln(h, L["w_ff2_t"], L["b_ff2"],
                                  y1, L["ln2_g"], L["ln2_b"])

        x = y2.reshape(B, S, E)
    return x


# ---------------------------------------------------------------------------
# Pure-JAX reference (mirrors the PyTorch module, eval / no-mask path, f32)
# ---------------------------------------------------------------------------
def _layer_norm_ref(x, g, b, eps=1e-5):
    m = jnp.mean(x, axis=-1, keepdims=True)
    c = x - m
    v = jnp.mean(c * c, axis=-1, keepdims=True)
    return c * lax.rsqrt(v + eps) * g + b


def transformer_encoder_reference(raw, tokens):
    B, S = tokens.shape
    x = raw["embedding"][tokens] + raw["pe"][:S][None, :, :]
    H = raw["num_heads"]
    for L in raw["layers"]:
        E = x.shape[-1]
        D = E // H
        q = x @ L["wq"].T + L["bq"]
        k = x @ L["wk"].T + L["bk"]
        v = x @ L["wv"].T + L["bv"]
        Q = q.reshape(B, S, H, D).transpose(0, 2, 1, 3)
        K = k.reshape(B, S, H, D).transpose(0, 2, 1, 3)
        V = v.reshape(B, S, H, D).transpose(0, 2, 1, 3)
        s = jnp.einsum("bhqd,bhkd->bhqk", Q, K) / jnp.sqrt(jnp.float32(D))
        w = jax.nn.softmax(s, axis=-1)
        o = jnp.einsum("bhqk,bhkd->bhqd", w, V)
        o = o.transpose(0, 2, 1, 3).reshape(B, S, E)
        a = o @ L["wo"].T + L["bo"]
        x = _layer_norm_ref(x + a, L["ln1_g"], L["ln1_b"])
        ff = jnp.maximum(x @ L["wff1"].T + L["bff1"], 0.0)
        ff = ff @ L["wff2"].T + L["bff2"]
        x = _layer_norm_ref(x + ff, L["ln2_g"], L["ln2_b"])
    return x


if __name__ == "__main__":
    # small deterministic config
    vocab_size = 50
    embed_dim = 32
    num_heads = 4
    num_layers = 2
    dim_feedforward = 64
    max_len = 64
    batch, seq = 2, 8

    root = jax.random.PRNGKey(0)
    k_params, k_tokens = jax.random.split(root)

    raw = init_raw_params(k_params, vocab_size, embed_dim, num_heads,
                          num_layers, dim_feedforward, max_len)
    prep = prepare_kernel_params(raw)

    tokens = jax.random.randint(k_tokens, (batch, seq), 0, vocab_size,
                                dtype=jnp.int32)

    out = transformer_encoder_forward(prep, tokens)
    out = jax.block_until_ready(out)

    ref = transformer_encoder_reference(raw, tokens)
    ref = jax.block_until_ready(ref)

    assert out.shape == (batch, seq, embed_dim)
    out_f32 = out.astype(jnp.float32)
    assert jnp.all(jnp.isfinite(out_f32))
    # bf16 activations/weights + approx reciprocal in softmax -> loose tols;
    # any real logic bug (softmax/LN/matmul) would produce O(1) errors.
    assert jnp.allclose(out_f32, ref, atol=1e-1, rtol=1e-1), (
        float(jnp.max(jnp.abs(out_f32 - ref)))
    )

    print("KERNEL_OK")
</pallas_src>

<mosaic_0001>
module attributes {stable_mosaic.version = 11 : i64} {
  func.func @_qkv_linear_kernel(%arg0: i32, %arg1: i32, %arg2: memref<16x32xbf16, #tpu.memory_space<vmem>>, %arg3: memref<32x96xbf16, #tpu.memory_space<vmem>>, %arg4: memref<1x96xf32, #tpu.memory_space<vmem>>, %arg5: memref<16x32xbf16, #tpu.memory_space<vmem>>, %arg6: memref<16x32xbf16, #tpu.memory_space<vmem>>, %arg7: memref<16x32xbf16, #tpu.memory_space<vmem>>, %arg8: memref<16x96xf32, #tpu.memory_space<vmem>>) attributes {dimension_semantics = [#tpu.dimension_semantics<parallel>, #tpu.dimension_semantics<arbitrary>], iteration_bounds = array<i64: 1, 1>, scalar_prefetch = 0 : i64, scratch_operands = 1 : i64, tpu.core_type = #tpu.core_type<tc>, window_params = [{transform_indices = @transform_0, window_bounds = array<i64: 16, 32>}, {transform_indices = @transform_1, window_bounds = array<i64: 32, 96>}, {pipeline_mode = #tpu.pipeline_mode<synchronous>, transform_indices = @transform_2, window_bounds = array<i64: 1, 96>}, {transform_indices = @transform_3, window_bounds = array<i64: 16, 32>}, {transform_indices = @transform_4, window_bounds = array<i64: 16, 32>}, {transform_indices = @transform_5, window_bounds = array<i64: 16, 32>}]} {
    %c0_i32 = arith.constant 0 : i32
    %0 = arith.cmpi eq, %arg1, %c0_i32 : i32
    %1 = arith.extui %0 : i1 to i32
    %c0_i32_0 = arith.constant 0 : i32
    %2 = arith.cmpi ne, %1, %c0_i32_0 : i32
    scf.if %2 {
      %cst_10 = arith.constant 0.000000e+00 : f32
      %12 = vector.broadcast %cst_10 : f32 to vector<16x96xf32>
      %c0_11 = arith.constant 0 : index
      %c0_12 = arith.constant 0 : index
      %13 = vector.load %arg8[%c0_11, %c0_12] : memref<16x96xf32, #tpu.memory_space<vmem>>, vector<16x96xf32>
      tpu.vector_store %arg8[%c0_11, %c0_12], %12 {strides = array<i32>} : memref<16x96xf32, #tpu.memory_space<vmem>>, vector<16x96xf32>,
    } else {
    }
    %c0 = arith.constant 0 : index
    %c0_1 = arith.constant 0 : index
    %3 = vector.load %arg8[%c0, %c0_1] : memref<16x96xf32, #tpu.memory_space<vmem>>, vector<16x96xf32>
    %c0_2 = arith.constant 0 : index
    %c0_3 = arith.constant 0 : index
    %4 = vector.load %arg2[%c0_2, %c0_3] : memref<16x32xbf16, #tpu.memory_space<vmem>>, vector<16x32xbf16>
    %c0_4 = arith.constant 0 : index
    %c0_5 = arith.constant 0 : index
    %5 = vector.load %arg3[%c0_4, %c0_5] : memref<32x96xbf16, #tpu.memory_space<vmem>>, vector<32x96xbf16>
    %cst = arith.constant dense<0.000000e+00> : vector<16x96xf32>
    %6 = tpu.matmul %4, %5, %cst {dimension_numbers = #tpu.dot_dimension_numbers<[1], [0], [0], [1], [0, 0, 1, 1], [], []>} : vector<16x32xbf16>, vector<32x96xbf16>, vector<16x96xf32> -> vector<16x96xf32>
    %7 = arith.addf %3, %6 : vector<16x96xf32>
    %c0_6 = arith.constant 0 : index
    %c0_7 = arith.constant 0 : index
    %8 = vector.load %arg8[%c0_6, %c0_7] : memref<16x96xf32, #tpu.memory_space<vmem>>, vector<16x96xf32>
    tpu.vector_store %arg8[%c0_6, %c0_7], %7 {strides = array<i32>} : memref<16x96xf32, #tpu.memory_space<vmem>>, vector<16x96xf32>,
    %c0_i32_8 = arith.constant 0 : i32
    %9 = arith.cmpi eq, %arg1, %c0_i32_8 : i32
    %10 = arith.extui %9 : i1 to i32
    %c0_i32_9 = arith.constant 0 : i32
    %11 = arith.cmpi ne, %10, %c0_i32_9 : i32
    scf.if %11 {
      %c0_10 = arith.constant 0 : index
      %c0_11 = arith.constant 0 : index
      %12 = vector.load %arg8[%c0_10, %c0_11] : memref<16x96xf32, #tpu.memory_space<vmem>>, vector<16x96xf32>
      %c0_12 = arith.constant 0 : index
      %c0_13 = arith.constant 0 : index
      %13 = vector.load %arg4[%c0_12, %c0_13] : memref<1x96xf32, #tpu.memory_space<vmem>>, vector<1x96xf32>
      %14 = vector.broadcast %13 : vector<1x96xf32> to vector<16x96xf32>
      %15 = arith.addf %12, %14 : vector<16x96xf32>
      %16 = vector.extract_strided_slice %15 {offsets = [0, 0], sizes = [16, 32], strides = [1, 1]} : vector<16x96xf32> to vector<16x32xf32>
      %17 = arith.truncf %16 : vector<16x32xf32> to vector<16x32xbf16>
      %c0_14 = arith.constant 0 : index
      %c0_15 = arith.constant 0 : index
      %18 = vector.load %arg5[%c0_14, %c0_15] : memref<16x32xbf16, #tpu.memory_space<vmem>>, vector<16x32xbf16>
      tpu.vector_store %arg5[%c0_14, %c0_15], %17 {strides = array<i32>} : memref<16x32xbf16, #tpu.memory_space<vmem>>, vector<16x32xbf16>,
      %19 = vector.extract_strided_slice %15 {offsets = [0, 32], sizes = [16, 32], strides = [1, 1]} : vector<16x96xf32> to vector<16x32xf32>
      %20 = arith.truncf %19 : vector<16x32xf32> to vector<16x32xbf16>
      %c0_16 = arith.constant 0 : index
      %c0_17 = arith.constant 0 : index
      %21 = vector.load %arg6[%c0_16, %c0_17] : memref<16x32xbf16, #tpu.memory_space<vmem>>, vector<16x32xbf16>
      tpu.vector_store %arg6[%c0_16, %c0_17], %20 {strides = array<i32>} : memref<16x32xbf16, #tpu.memory_space<vmem>>, vector<16x32xbf16>,
      %22 = vector.extract_strided_slice %15 {offsets = [0, 64], sizes = [16, 32], strides = [1, 1]} : vector<16x96xf32> to vector<16x32xf32>
      %23 = arith.truncf %22 : vector<16x32xf32> to vector<16x32xbf16>
      %c0_18 = arith.constant 0 : index
      %c0_19 = arith.constant 0 : index
      %24 = vector.load %arg7[%c0_18, %c0_19] : memref<16x32xbf16, #tpu.memory_space<vmem>>, vector<16x32xbf16>
      tpu.vector_store %arg7[%c0_18, %c0_19], %23 {strides = array<i32>} : memref<16x32xbf16, #tpu.memory_space<vmem>>, vector<16x32xbf16>,
    } else {
    }
    return
  }
  func.func @transform_0(%arg0: i32, %arg1: i32) -> (i32, i32) {
    %c0_i32 = arith.constant 0 : i32
    return %arg0, %arg1 : i32, i32
  }
  func.func @transform_1(%arg0: i32, %arg1: i32) -> (i32, i32) {
    %c0_i32 = arith.constant 0 : i32
    %c0_i32_0 = arith.constant 0 : i32
    return %arg1, %c0_i32 : i32, i32
  }
  func.func @transform_2(%arg0: i32, %arg1: i32) -> (i32, i32) {
    %c0_i32 = arith.constant 0 : i32
    %c0_i32_0 = arith.constant 0 : i32
    %c0_i32_1 = arith.constant 0 : i32
    return %c0_i32, %c0_i32_0 : i32, i32
  }
  func.func @transform_3(%arg0: i32, %arg1: i32) -> (i32, i32) {
    %c0_i32 = arith.constant 0 : i32
    %c0_i32_0 = arith.constant 0 : i32
    return %arg0, %c0_i32 : i32, i32
  }
  func.func @transform_4(%arg0: i32, %arg1: i32) -> (i32, i32) {
    %c0_i32 = arith.constant 0 : i32
    %c0_i32_0 = arith.constant 0 : i32
    return %arg0, %c0_i32 : i32, i32
  }
  func.func @transform_5(%arg0: i32, %arg1: i32) -> (i32, i32) {
    %c0_i32 = arith.constant 0 : i32
    %c0_i32_0 = arith.constant 0 : i32
    return %arg0, %c0_i32 : i32, i32
  }
}

</mosaic_0001>

<bundles_post_ra>
// kernel: tpu_custom_call.1
= control target key start
LH: loop header
LB: loop body
LE: loop exit
PB: predicated region body
PF: predicated region fallthrough
CT: control target
= control target key end

     0   :  { %11 = vsyncpa [#allocation4], 0  ;;  %s508_s0 = inlined_call_operand.hbm [shape: bf16[16,32], index: 0, kind: input, shape index: {}]   ;;  %s509_s1 = inlined_call_operand.hbm [shape: bf16[32,96], index: 1, kind: input, shape index: {}]   ;;  %s510_s2 = inlined_call_operand.vmem [shape: f32[1,96], index: 2, kind: input, shape index: {}]   ;;  %s511_s3 = inlined_call_operand.hbm [shape: bf16[16,32], index: 3, kind: output, shape index: {0}]   ;;  %s512_s4 = inlined_call_operand.hbm [shape: bf16[16,32], index: 4, kind: output, shape index: {1}]   ;;  %s513_s5 = inlined_call_operand.hbm [shape: bf16[16,32], index: 5, kind: output, shape index: {2}]  }
   0x1   :  { %12 = vsyncpa [#allocation7], 0 }
   0x2   :  { %13 = vsyncpa [#allocation5], 0 }
   0x3   :  { %14 = vsyncpa [#allocation10], 0  ;;  %s371_s18 = smov [#allocation3]   ;;  %s253_s22 = scalar_lea.hbm %s508_s0, 128 }
   0x4   :  { %s20_s19 = sshll.u32 %s371_s18, 4  ;;  %p254_p0 = scmp.ne.s32.totalorder %s508_s0, %s253_s22  ;;  %s21_s19 = int_to_ptr.vmem [resolvable:$true] %s20_s19 }
   0x5   :  { %p257_p1 = scmp.lt.u32.totalorder %s253_s22, %s508_s0 }
   0x7   :  { %p259_p2 = pnand %p257_p1, %p254_p0 }
   0x9   :  { %262 = shalt.err (!%p259_p2)
}
   0xa   :  { %s263_s27 = scalar_lea.vmem %s21_s19, 128  ;;  %p268_p4 = scmp.lt.s32.totalorder %s21_s19, %s21_s19 }
   0xb   :  { %p264_p3 = scmp.ne.s32.totalorder %s21_s19, %s263_s27  ;;  %p269_p5 = scmp.lt.s32.totalorder %s263_s27, %s263_s27 }
   0xd   :  { %p270_p6 = por %p269_p5, %p268_p4 }
   0xf   :  { %p271_p7 = pnand %p270_p6, %p264_p3 }
  0x11   :  { %274 = shalt.err (!%p271_p7)
}
  0x12   :  { %s372_s28 = smov 64   ;;  %s373_s29 = smov 4  }
  0x13   :  { %26 = dma.hbm_to_vmem [thread:$0]  %s508_s0, 128, %s21_s19, [#allocation4], %s372_s28, %s372_s28, %s373_s29  }
  0x14   :  { %s374_s7 = smov [#allocation6]   ;;  %s275_s11 = scalar_lea.hbm %s509_s1, 256 }
  0x15   :  { %s32_s8 = sshll.u32 %s374_s7, 4  ;;  %p276_p8 = scmp.ne.s32.totalorder %s509_s1, %s275_s11  ;;  %s33_s8 = int_to_ptr.vmem [resolvable:$true] %s32_s8 }
  0x16   :  { %p279_p9 = scmp.lt.u32.totalorder %s275_s11, %s509_s1 }
  0x18   :  { %p281_p10 = pnand %p279_p9, %p276_p8 }
  0x1a   :  { %284 = shalt.err (!%p281_p10)
}
  0x1b   :  { %s285_s16 = scalar_lea.vmem %s33_s8, 256  ;;  %p290_p12 = scmp.lt.s32.totalorder %s33_s8, %s33_s8 }
  0x1c   :  { %p286_p11 = scmp.ne.s32.totalorder %s33_s8, %s285_s16  ;;  %p291_p13 = scmp.lt.s32.totalorder %s285_s16, %s285_s16 }
  0x1e   :  { %p292_p0 = por %p291_p13, %p290_p12 }
  0x20   :  { %p293_p1 = pnand %p292_p0, %p286_p11 }
  0x22   :  { %296 = shalt.err (!%p293_p1)
}
  0x23   :  { %38 = dma.hbm_to_vmem [thread:$0]  %s509_s1, 256, %s33_s8, [#allocation7], %s372_s28, %s372_s28, %s373_s29  }
  0x24   :  { %363 = dma.done.wait [#allocation4], 128  }
  0x25   :  { %364 = vsyncadd [#allocation4], 4294967168 }
  0x26   :  { %365 = dma.done.wait [#allocation7], 256  }
  0x27   :  { %366 = vsyncadd [#allocation7], 4294967040  ;;  %vm52_vm0 = vcmask 785408   ;;  %v375_v0 = vmov 0.0   ;;  %vm376_vm1 = vmmov 0   ;;  %v250_v1 = vld [vmem:[#allocation6] sm:$0xff]  }
  0x28   :  { %53 = vst.msk [vmem:[#allocation2] sm:$0xff] %vm52_vm0, %v375_v0  ;;  %54 = vst.msk [vmem:[#allocation2 + $0x8] sm:$0xff] %vm52_vm0, %v375_v0  ;;  %232 = vmatprep.subr.bf16.mxu0 %v375_v0  ;;  %236 = vmatprep.mubr.msk.bf16.mxu0 %vm376_vm1, %v375_v0  ;;  %v251_v2 = vld [vmem:[#allocation6 + $0x8] sm:$0xff]   ;;  %v252_v3 = vld [vmem:[#allocation3] sm:$0xff]   ;;  %vm80_vm2 = vcmask 261120   ;;  %vm152_vm3 = vcmask 257024  }
  0x29   :  { %233 = vmatpush3.bf16.msra.mxu0 %v250_v1  ;;  %v224_v12 = vld [vmem:[%s510_s2] ss:$0 sm:$0xff]  ;;  %s377_s19 = smov [#allocation8]   ;;  %s378_s21 = smov 96  }
  0x2a   :  { %234 = vmatprep.subr.bf16.mxu0 %v375_v0  ;;  %s176_s20 = sshll.u32 %s377_s19, 4  ;;  %s177_s20 = int_to_ptr.vmem [resolvable:$true] %s176_s20 }
  0x2b   :  { %s297_s22 = scalar_lea.vmem %s177_s20, 128  ;;  %p302_p3 = scmp.lt.s32.totalorder %s177_s20, %s177_s20 }
  0x2c   :  { %p298_p2 = scmp.ne.s32.totalorder %s177_s20, %s297_s22  ;;  %p303_p4 = scmp.lt.s32.totalorder %s297_s22, %s297_s22 }
  0x2d   :  { %235 = vmatpush3.bf16.msra.mxu0 %v251_v2 }
  0x2e   :  { %p304_p5 = por %p303_p4, %p302_p3 }
  0x2f   :  { %v55_v4 = vld [vmem:[#allocation2] sm:$0xff]  ;;  %v56_v6 = vld [vmem:[#allocation2 + $0x8] sm:$0xff] }
  0x30   :  { %237 = vmatmul.mubr.msk.bf16.vlgmr.msra.gmra.mrb[0].mxu0 %vm80_vm2, %v252_v3  ;;  %p305_p6 = pnand %p304_p5, %p298_p2 }
 0x103   :  { %v118_v5 = vpop.f32.mrb[0].mxu0 }
 0x104   :  { %v125_v7 = vadd.f32 %v118_v5, %v55_v4  ;;  %v238_v8 = vpop.f32.mrb[1].mxu0 }
 0x105   :  { %v121_v9 = vpop.f32.mrb[2].mxu0 }
 0x106   :  { %128 = vst.msk [vmem:[#allocation2] sm:$0xff] %vm52_vm0, %v125_v7  ;;  %v126_v10 = vadd.f32 %v121_v9, %v56_v6  ;;  %v239_v11 = vpop.f32.mrb[3].mxu0 }
 0x108   :  { %129 = vst.msk [vmem:[#allocation2 + $0x8] sm:$0xff] %vm52_vm0, %v126_v10 }
 0x10d   :  { %v133_v13 = vld [vmem:[#allocation2] sm:$0xff] }
 0x10e   :  { %v142_v14 = vadd.f32 %v224_v12, %v133_v13 }
 0x10f   :  { %v134_v15 = vld [vmem:[#allocation2 + $0x8] sm:$0xff] }
 0x110   :  { %v227_v16 = vpack.c.bf16 %v142_v14, %v142_v14  ;;  %v143_v17 = vadd.f32 %v224_v12, %v134_v15 }
 0x112   :  { %163 = vrot.lane.b32.xlu1 %v227_v16, %s372_s28  ;;  %155 = vrot.lane.b32.xlu0 %v227_v16, %s378_s21  ;;  %v228_v18 = vpack.c.bf16 %v143_v17, %v143_v17  ;;  %153 = vst.msk [vmem:[#allocation8] sm:$0xf] %vm152_vm3, %v227_v16 }
 0x114   :  { %154 = vst.msk [vmem:[#allocation8 + $0x4] sm:$0xf] %vm152_vm3, %v228_v18 }
 0x115   :  { %308 = shalt.err (!%p305_p6)
}
 0x116   :  { %s309_s24 = scalar_lea.hbm %s511_s3, 128 }
 0x117   :  { %p310_p7 = scmp.ne.s32.totalorder %s511_s3, %s309_s24  ;;  %p313_p8 = scmp.lt.u32.totalorder %s309_s24, %s511_s3 }
 0x119   :  { %p315_p9 = pnand %p313_p8, %p310_p7 }
 0x11b   :  { %318 = shalt.err (!%p315_p9)
}
 0x11c   :  { %182 = dma.vmem_to_hbm [thread:$0]  %s177_s20, 128, %s511_s3, [#allocation5], %s372_s28, %s372_s28, %s373_s29  }
 0x11d   :  { %165 = vrot.lane.b32.xlu1 %v228_v18, %s372_s28  ;;  %157 = vrot.lane.b32.xlu0 %v228_v18, %s378_s21  ;;  %s379_s8 = smov [#allocation9]   ;;  %s380_s10 = smov [#allocation11]  }
 0x11e   :  { %s188_s9 = sshll.u32 %s379_s8, 4  ;;  %s200_s11 = sshll.u32 %s380_s10, 4  ;;  %s189_s9 = int_to_ptr.vmem [resolvable:$true] %s188_s9  ;;  %s469_s11 = int_to_ptr.vmem [resolvable:$true] %s200_s11 }
 0x11f   :  { %s319_s3 = scalar_lea.vmem %s189_s9, 128  ;;  %p324_p11 = scmp.lt.s32.totalorder %s189_s9, %s189_s9 }
 0x120   :  { %p320_p10 = scmp.ne.s32.totalorder %s189_s9, %s319_s3  ;;  %p325_p12 = scmp.lt.s32.totalorder %s319_s3, %s319_s3 }
 0x122   :  { %p326_p13 = por %p325_p12, %p324_p11 }
 0x124   :  { %p327_p0 = pnand %p326_p13, %p320_p10 }
 0x184   :  { %v164_v19 = vpop.permute.xlu1 %163  ;;  %v156_v20 = vpop.permute.xlu0 %155 }
 0x185   :  { %169 = vst.msk [vmem:[#allocation11] sm:$0xf] %vm152_vm3, %v164_v19  ;;  %161 = vst.msk [vmem:[#allocation9] sm:$0xf] %vm152_vm3, %v156_v20 }
 0x18f   :  { %v166_v21 = vpop.permute.xlu1 %165  ;;  %v158_v22 = vpop.permute.xlu0 %157 }
 0x190   :  { %170 = vst.msk [vmem:[#allocation11 + $0x4] sm:$0xf] %vm152_vm3, %v166_v21  ;;  %162 = vst.msk [vmem:[#allocation9 + $0x4] sm:$0xf] %vm152_vm3, %v158_v22 }
 0x191   :  { %330 = shalt.err (!%p327_p0)
}
 0x192   :  { %s331_s14 = scalar_lea.hbm %s512_s4, 128 }
 0x193   :  { %p332_p1 = scmp.ne.s32.totalorder %s512_s4, %s331_s14  ;;  %p335_p2 = scmp.lt.u32.totalorder %s331_s14, %s512_s4 }
 0x195   :  { %p337_p3 = pnand %p335_p2, %p332_p1 }
 0x197   :  { %340 = shalt.err (!%p337_p3)
}
 0x198   :  { %194 = dma.vmem_to_hbm [thread:$0]  %s189_s9, 128, %s512_s4, [#allocation10], %s372_s28, %s372_s28, %s373_s29  }
 0x199   :  { %s341_s19 = scalar_lea.vmem %s469_s11, 128  ;;  %p346_p5 = scmp.lt.s32.totalorder %s469_s11, %s469_s11 }
 0x19a   :  { %p342_p4 = scmp.ne.s32.totalorder %s469_s11, %s341_s19  ;;  %p347_p6 = scmp.lt.s32.totalorder %s341_s19, %s341_s19 }
 0x19c   :  { %p348_p7 = por %p347_p6, %p346_p5 }
 0x19e   :  { %p349_p8 = pnand %p348_p7, %p342_p4 }
 0x1a0   :  { %352 = shalt.err (!%p349_p8)
}
 0x1a1   :  { %s353_s22 = scalar_lea.hbm %s513_s5, 128 }
 0x1a2   :  { %p354_p9 = scmp.ne.s32.totalorder %s513_s5, %s353_s22  ;;  %p357_p10 = scmp.lt.u32.totalorder %s353_s22, %s513_s5 }
 0x1a4   :  { %p359_p11 = pnand %p357_p10, %p354_p9 }
 0x1a6   :  { %362 = shalt.err (!%p359_p11)
}
 0x1a7   :  { %206 = dma.vmem_to_hbm [thread:$0]  %s469_s11, 128, %s513_s5, [#allocation10], %s372_s28, %s372_s28, %s373_s29  }
 0x1a8   :  { %367 = dma.done.wait [#allocation5], 128  }
 0x1a9   :  { %368 = vsyncadd [#allocation5], 4294967168 }
 0x1aa   :  { %369 = dma.done.wait [#allocation10], 256  }
 0x1ab   :  { %370 = vsyncadd [#allocation10], 4294967040 }
 0x1ac   :  { %216 = vsyncpa [#allocation4], 1 }
 0x1ad   :  { %217 = vsyncpa [#allocation7], 1 }
 0x1ae   :  { %218 = vsyncpa [#allocation5], 1 }
 0x1af   :  { %219 = vsyncpa [#allocation10], 1 }

</bundles_post_ra>
